<compile_context>
chip_gen: v7x
topology: tpu7x:2x2x1
jax: 0.10.0
libtpu: 0.0.40
codegen_flags: <defaults>
</compile_context>

<pallas_src>
import math

import jax
import jax.numpy as jnp
from jax.experimental import pallas as pl
from jax.experimental.pallas import tpu as pltpu


_COMPUTE_DTYPE = jnp.float32
_VMEM_WORKING_SET_BUDGET = 24 * 1024 * 1024   # double-buffered x + out blocks
_VMEM_LIMIT_BYTES = 32 * 1024 * 1024


def _make_kernel(g: int):
    """Kernel with g timesteps lane-packed per kernel row."""

    def kernel(x_ref, freqs_ref, phase_ref, out_ref):
        # x_ref:     (tb, g)      f32 timesteps, g batch rows per kernel row
        # freqs_ref: (g, g*dim)   block-diagonal duplicated frequency table
        # phase_ref: (1, g*dim)   0 for sin columns, pi/2 for cos columns
        # out_ref:   (tb, g*dim)
        # Each term is a lane-broadcast multiply; the sum realizes
        #   emb[r, c] = x[r, c // dim] * freq_full[c % dim]
        # without any cross-lane data movement (exact f32, VPU only).
        emb = x_ref[:, 0:1] * freqs_ref[0:1, :]
        for j in range(1, g):
            emb = emb + x_ref[:, j:j + 1] * freqs_ref[j:j + 1, :]
        out_ref[...] = jnp.sin(emb + phase_ref[...]).astype(out_ref.dtype)

    return kernel


def _tables(dim: int, g: int):
    """Trace-time frequency / phase tables for the lane-packed layout."""
    half_dim = dim // 2 + 1
    scale = math.log(10000.0) / (half_dim - 1)
    freq = jnp.exp(jnp.arange(half_dim, dtype=_COMPUTE_DTYPE) * -scale)   # (half_dim,)
    freq_full = jnp.concatenate([freq, freq[: dim - half_dim]])           # (dim,)
    phase_full = jnp.concatenate(
        [jnp.zeros((half_dim,), _COMPUTE_DTYPE),
         jnp.full((dim - half_dim,), 0.5 * math.pi, _COMPUTE_DTYPE)])     # (dim,)
    # Block-diagonal freq table: row j carries freq_full in cols [j*dim,(j+1)*dim).
    eye = jnp.eye(g, dtype=_COMPUTE_DTYPE)
    freqs_g = (eye[:, :, None] * freq_full[None, None, :]).reshape(g, g * dim)
    phase_g = jnp.tile(phase_full, g)[None, :]                            # (1, g*dim)
    return freqs_g, phase_g


def _launch(kernel, x2, freqs_g, phase_g, *, tb, rows, width, out_dtype, dim_sem):
    g = x2.shape[1]
    return pl.pallas_call(
        kernel,
        out_shape=jax.ShapeDtypeStruct((rows, width), out_dtype),
        grid=(pl.cdiv(rows, tb),),
        in_specs=[
            pl.BlockSpec((tb, g), lambda i: (i, 0)),                 # timesteps (tiled)
            pl.BlockSpec((freqs_g.shape[0], width), lambda i: (0, 0)),  # resident
            pl.BlockSpec((1, width), lambda i: (0, 0)),              # resident
        ],
        out_specs=pl.BlockSpec((tb, width), lambda i: (i, 0)),
        compiler_params=pltpu.CompilerParams(
            dimension_semantics=(dim_sem,),
            vmem_limit_bytes=_VMEM_LIMIT_BYTES,
        ),
    )(x2, freqs_g, phase_g)


def sinusoidal_pos_emb(x: jax.Array, dim: int) -> jax.Array:
    """Pallas equivalent of SinusoidalPosEmb(dim)(x) for a 1-D vector x."""
    assert x.ndim == 1, "expects a 1-D vector of timesteps, like the PyTorch module"
    assert dim >= 2, "dim < 2 divides by zero in the PyTorch module (half_dim - 1 == 0)"

    b = x.shape[0]
    out_dtype = jnp.promote_types(x.dtype, jnp.float32)

    # Lane packing factor: g timesteps per kernel row so the output block's
    # last dim is (a multiple of) 128 lanes.  Capped at 16 so the unrolled
    # per-group accumulation stays a handful of VPU ops next to the sin.
    g = min(128 // dim, 16) if (dim < 128 and 128 % dim == 0) else 1
    width = g * dim
    rows = pl.cdiv(b, g)                     # packed kernel rows

    # Tile rows: fill ~24 MiB of double-buffered VMEM, counting the output
    # block (tb*width*4 B) and the lane-padded x block (tb*128*4 B).
    bytes_per_row = 2 * 4 * (128 + width)    # 2 buffers x 4 B x (x_pad + out)
    tb_cap = max(8, (_VMEM_WORKING_SET_BUDGET // bytes_per_row) // 8 * 8)
    tb = rows if rows <= tb_cap else tb_cap

    # f32 compute regardless of input dtype (bf16 timesteps destroy the angle).
    x32 = x.astype(_COMPUTE_DTYPE)
    if rows * g != b:                        # pads only the tiny (b,) input
        x32 = jnp.pad(x32, (0, rows * g - b))
    x2 = x32.reshape(rows, g)

    freqs_g, phase_g = _tables(dim, g)
    kernel = _make_kernel(g)

    # CORE_PARALLEL actually splits the batch grid over v7x's two TensorCores
    # (plain "parallel" vs "arbitrary" is measured-neutral); fall back to
    # "parallel" if the toolchain rejects it, so the kernel always runs.
    try:
        kind = jax.devices()[0].device_kind.lower()
    except Exception:  # pragma: no cover
        kind = ""
    semantics = [pltpu.CORE_PARALLEL, "parallel"] if "v7" in kind else ["parallel"]

    out = None
    last_err = None
    for dim_sem in semantics:
        try:
            out = _launch(kernel, x2, freqs_g, phase_g, tb=tb, rows=rows,
                          width=width, out_dtype=out_dtype, dim_sem=dim_sem)
            break
        except Exception as e:  # pragma: no cover - toolchain dependent
            last_err = e
    if out is None:
        raise last_err

    out = out.reshape(rows * g, dim)         # contiguous relabeling: free
    # Row slice (one output copy) only when b % g != 0; never for g == 1.
    return out[:b] if rows * g != b else out


def _reference(x: jax.Array, dim: int) -> jax.Array:
    # Pure-JAX mirror of the PyTorch forward, for a correctness check.
    half_dim = dim // 2 + 1
    scale = math.log(10000.0) / (half_dim - 1)
    freq = jnp.exp(jnp.arange(half_dim, dtype=jnp.float32) * -scale)
    emb = x.astype(jnp.float32)[:, None] * freq[None, :]
    emb = jnp.concatenate([jnp.sin(emb), jnp.cos(emb)], axis=-1)
    return emb[:, :dim]


if __name__ == "__main__":
    key = jax.random.PRNGKey(0)

    # (B, DIM) cases: lane-packed & aligned, lane-packed & ragged batch, g == 1.
    cases = [(8, 32), (5, 32), (6, 48)]
    for B, DIM in cases:
        # Timesteps: deterministic positive floats (like diffusion t values).
        x = jax.random.uniform(key, (B,), dtype=jnp.float32,
                               minval=0.0, maxval=1000.0)
        out = jax.block_until_ready(sinusoidal_pos_emb(x, DIM))
        ref = _reference(x, DIM)

        assert out.shape == (B, DIM), (out.shape, (B, DIM))
        # cos(t) is realized as sin(t + pi/2); for t up to ~1e3 the f32 phase
        # add rounds the angle by ~3e-5 and Mosaic vs XLA sin range reductions
        # differ by a few ulp, so compare at 2e-4 absolute (outputs are O(1)).
        err = float(jnp.max(jnp.abs(out - ref)))
        assert jnp.allclose(out, ref, atol=2e-4, rtol=1e-5), (
            f"mismatch vs reference for B={B}, dim={DIM}: max abs err = {err}")

    print("KERNEL_OK")
</pallas_src>

<mosaic_0001>
module attributes {stable_mosaic.version = 11 : i64} {
  func.func @kernel(%arg0: i32, %arg1: memref<2x4xf32, #tpu.memory_space<vmem>>, %arg2: memref<4x128xf32, #tpu.memory_space<vmem>>, %arg3: memref<1x128xf32, #tpu.memory_space<vmem>>, %arg4: memref<2x128xf32, #tpu.memory_space<vmem>>) attributes {dimension_semantics = [#tpu.dimension_semantics<parallel>], iteration_bounds = array<i64: 1>, scalar_prefetch = 0 : i64, scratch_operands = 0 : i64, tpu.core_type = #tpu.core_type<tc>, window_params = [{transform_indices = @transform_0, window_bounds = array<i64: 2, 4>}, {pipeline_mode = #tpu.pipeline_mode<synchronous>, transform_indices = @transform_1, window_bounds = array<i64: 4, 128>}, {pipeline_mode = #tpu.pipeline_mode<synchronous>, transform_indices = @transform_2, window_bounds = array<i64: 1, 128>}, {transform_indices = @transform_3, window_bounds = array<i64: 2, 128>}]} {
    %c0 = arith.constant 0 : index
    %c0_0 = arith.constant 0 : index
    %0 = vector.load %arg1[%c0, %c0_0] : memref<2x4xf32, #tpu.memory_space<vmem>>, vector<2x1xf32>
    %c0_1 = arith.constant 0 : index
    %c0_2 = arith.constant 0 : index
    %1 = vector.load %arg2[%c0_1, %c0_2] : memref<4x128xf32, #tpu.memory_space<vmem>>, vector<1x128xf32>
    %2 = vector.broadcast %0 : vector<2x1xf32> to vector<2x128xf32>
    %3 = vector.broadcast %1 : vector<1x128xf32> to vector<2x128xf32>
    %4 = arith.mulf %2, %3 : vector<2x128xf32>
    %c0_3 = arith.constant 0 : index
    %c1 = arith.constant 1 : index
    %5 = vector.load %arg1[%c0_3, %c1] : memref<2x4xf32, #tpu.memory_space<vmem>>, vector<2x1xf32>
    %c1_4 = arith.constant 1 : index
    %c0_5 = arith.constant 0 : index
    %6 = vector.load %arg2[%c1_4, %c0_5] : memref<4x128xf32, #tpu.memory_space<vmem>>, vector<1x128xf32>
    %7 = vector.broadcast %5 : vector<2x1xf32> to vector<2x128xf32>
    %8 = vector.broadcast %6 : vector<1x128xf32> to vector<2x128xf32>
    %9 = arith.mulf %7, %8 : vector<2x128xf32>
    %10 = arith.addf %4, %9 : vector<2x128xf32>
    %c0_6 = arith.constant 0 : index
    %c2 = arith.constant 2 : index
    %11 = vector.load %arg1[%c0_6, %c2] : memref<2x4xf32, #tpu.memory_space<vmem>>, vector<2x1xf32>
    %c2_7 = arith.constant 2 : index
    %c0_8 = arith.constant 0 : index
    %12 = vector.load %arg2[%c2_7, %c0_8] : memref<4x128xf32, #tpu.memory_space<vmem>>, vector<1x128xf32>
    %13 = vector.broadcast %11 : vector<2x1xf32> to vector<2x128xf32>
    %14 = vector.broadcast %12 : vector<1x128xf32> to vector<2x128xf32>
    %15 = arith.mulf %13, %14 : vector<2x128xf32>
    %16 = arith.addf %10, %15 : vector<2x128xf32>
    %c0_9 = arith.constant 0 : index
    %c3 = arith.constant 3 : index
    %17 = vector.load %arg1[%c0_9, %c3] : memref<2x4xf32, #tpu.memory_space<vmem>>, vector<2x1xf32>
    %c3_10 = arith.constant 3 : index
    %c0_11 = arith.constant 0 : index
    %18 = vector.load %arg2[%c3_10, %c0_11] : memref<4x128xf32, #tpu.memory_space<vmem>>, vector<1x128xf32>
    %19 = vector.broadcast %17 : vector<2x1xf32> to vector<2x128xf32>
    %20 = vector.broadcast %18 : vector<1x128xf32> to vector<2x128xf32>
    %21 = arith.mulf %19, %20 : vector<2x128xf32>
    %22 = arith.addf %16, %21 : vector<2x128xf32>
    %c0_12 = arith.constant 0 : index
    %c0_13 = arith.constant 0 : index
    %23 = vector.load %arg3[%c0_12, %c0_13] : memref<1x128xf32, #tpu.memory_space<vmem>>, vector<1x128xf32>
    %24 = vector.broadcast %23 : vector<1x128xf32> to vector<2x128xf32>
    %25 = arith.addf %22, %24 : vector<2x128xf32>
    %26 = math.sin %25 : vector<2x128xf32>
    %c0_14 = arith.constant 0 : index
    %c0_15 = arith.constant 0 : index
    %27 = vector.load %arg4[%c0_14, %c0_15] : memref<2x128xf32, #tpu.memory_space<vmem>>, vector<2x128xf32>
    tpu.vector_store %arg4[%c0_14, %c0_15], %26 {strides = array<i32>} : memref<2x128xf32, #tpu.memory_space<vmem>>, vector<2x128xf32>,
    return
  }
  func.func @transform_0(%arg0: i32) -> (i32, i32) {
    %c0_i32 = arith.constant 0 : i32
    %c0_i32_0 = arith.constant 0 : i32
    return %arg0, %c0_i32 : i32, i32
  }
  func.func @transform_1(%arg0: i32) -> (i32, i32) {
    %c0_i32 = arith.constant 0 : i32
    %c0_i32_0 = arith.constant 0 : i32
    %c0_i32_1 = arith.constant 0 : i32
    return %c0_i32, %c0_i32_0 : i32, i32
  }
  func.func @transform_2(%arg0: i32) -> (i32, i32) {
    %c0_i32 = arith.constant 0 : i32
    %c0_i32_0 = arith.constant 0 : i32
    %c0_i32_1 = arith.constant 0 : i32
    return %c0_i32, %c0_i32_0 : i32, i32
  }
  func.func @transform_3(%arg0: i32) -> (i32, i32) {
    %c0_i32 = arith.constant 0 : i32
    %c0_i32_0 = arith.constant 0 : i32
    return %arg0, %c0_i32 : i32, i32
  }
}

</mosaic_0001>

<bundles_post_ra>
// kernel: tpu_custom_call.1
= control target key start
LH: loop header
LB: loop body
LE: loop exit
PB: predicated region body
PF: predicated region fallthrough
CT: control target
= control target key end

     0   :  { %8 = vsyncpa [#allocation3], 0  ;;  %s413_s0 = inlined_call_operand.hbm [shape: f32[2,4], index: 0, kind: input, shape index: {}]   ;;  %s414_s1 = inlined_call_operand.hbm [shape: f32[4,128], index: 1, kind: input, shape index: {}]   ;;  %s415_s2 = inlined_call_operand.vmem [shape: f32[1,128], index: 2, kind: input, shape index: {}]   ;;  %s416_s3 = inlined_call_operand.hbm [shape: f32[2,128], index: 3, kind: output, shape index: {}]  }
   0x1   :  { %9 = vsyncpa [#allocation6], 0 }
   0x2   :  { %10 = vsyncpa [#allocation4], 0  ;;  %s320_s12 = smov [#allocation2]   ;;  %s321_s14 = smov [#allocation5]  }
   0x3   :  { %s17_s13 = sshll.u32 %s320_s12, 4  ;;  %s27_s15 = sshll.u32 %s321_s14, 4  ;;  %s18_s13 = int_to_ptr.vmem [resolvable:$true] %s17_s13  ;;  %s28_s15 = int_to_ptr.vmem [resolvable:$true] %s27_s15 }
   0x4   :  { %s248_s18 = scalar_lea.hbm %s413_s0, 32 }
   0x5   :  { %p249_p0 = scmp.ne.s32.totalorder %s413_s0, %s248_s18  ;;  %p252_p1 = scmp.lt.u32.totalorder %s248_s18, %s413_s0 }
   0x7   :  { %p254_p2 = pnand %p252_p1, %p249_p0 }
   0x9   :  { %257 = shalt.err (!%p254_p2)
}
   0xa   :  { %s258_s23 = scalar_lea.vmem %s18_s13, 32  ;;  %p263_p4 = scmp.lt.s32.totalorder %s18_s13, %s18_s13 }
   0xb   :  { %p259_p3 = scmp.ne.s32.totalorder %s18_s13, %s258_s23  ;;  %p264_p5 = scmp.lt.s32.totalorder %s258_s23, %s258_s23 }
   0xd   :  { %p265_p6 = por %p264_p5, %p263_p4 }
   0xf   :  { %p266_p7 = pnand %p265_p6, %p259_p3 }
  0x11   :  { %269 = shalt.err (!%p266_p7)
}
  0x12   :  { %20 = dma.hbm_to_vmem [thread:$0]  %s413_s0, 32, %s18_s13, [#allocation3]  }
  0x13   :  { %s270_s28 = scalar_lea.hbm %s414_s1, 64 }
  0x14   :  { %p271_p8 = scmp.ne.s32.totalorder %s414_s1, %s270_s28  ;;  %p274_p9 = scmp.lt.u32.totalorder %s270_s28, %s414_s1 }
  0x16   :  { %p276_p10 = pnand %p274_p9, %p271_p8 }
  0x18   :  { %279 = shalt.err (!%p276_p10)
}
  0x19   :  { %s280_s6 = scalar_lea.vmem %s28_s15, 64  ;;  %p285_p12 = scmp.lt.s32.totalorder %s28_s15, %s28_s15 }
  0x1a   :  { %p281_p11 = scmp.ne.s32.totalorder %s28_s15, %s280_s6  ;;  %p286_p13 = scmp.lt.s32.totalorder %s280_s6, %s280_s6 }
  0x1c   :  { %p287_p0 = por %p286_p13, %p285_p12 }
  0x1e   :  { %p288_p1 = pnand %p287_p0, %p281_p11 }
  0x20   :  { %291 = shalt.err (!%p288_p1)
}
  0x21   :  { %30 = dma.hbm_to_vmem [thread:$0]  %s414_s1, 64, %s28_s15, [#allocation6]  }
  0x22   :  { %314 = dma.done.wait [#allocation3], 32  }
  0x23   :  { %315 = vsyncadd [#allocation3], 4294967264 }
  0x24   :  { %316 = dma.done.wait [#allocation6], 64  }
  0x25   :  { %317 = vsyncadd [#allocation6], 4294967232  ;;  %v322_v0 = vmov 0   ;;  %v323_v1 = vmov 2   ;;  %v39_v2 = vld [vmem:[#allocation2] sm:$0x3] }
  0x26   :  { %239 = vset.pattern.permute.xlu0 %v322_v0  ;;  %241 = vset.pattern.permute.xlu1 %v323_v1  ;;  %v324_v3 = vmov 1   ;;  %v325_v4 = vmov 3   ;;  %v213_v7 = vld [vmem:[#allocation5] ss:$0 sm:$0xff]  ;;  %v214_v8 = vld [vmem:[#allocation5 + $0x1] ss:$0 sm:$0xff] }
  0x27   :  { %43 = vperm.xlu0 %239, %v39_v2   ;;  %64 = vperm.xlu1 %241, %v39_v2   ;;  %v215_v9 = vld [vmem:[#allocation5 + $0x2] ss:$0 sm:$0xff]  ;;  %v216_v11 = vld [vmem:[#allocation5 + $0x3] ss:$0 sm:$0xff]  ;;  %v217_v19 = vld [vmem:[%s415_s2] ss:$0 sm:$0xff] }
  0x28   :  { %v326_v32 = vmov 683565275   ;;  %v327_v34 = vmov 2475754826   ;;  %v328_v37 = vmov 2131351028  }
  0x29   :  { %v329_v40 = vmov 2102212464   ;;  %v330_v43 = vmov 920167782   ;;  %v331_v46 = vmov 1326507024  }
  0x2a   :  { %s332_s2 = smov [#allocation7]  }
  0x2b   :  { %240 = vset.pattern.permute.xlu0 %v324_v3  ;;  %242 = vset.pattern.permute.xlu1 %v325_v4  ;;  %s203_s9 = sshll.u32 %s332_s2, 4  ;;  %s204_s9 = int_to_ptr.vmem [resolvable:$true] %s203_s9 }
  0x2c   :  { %53 = vperm.xlu0 %240, %v39_v2   ;;  %75 = vperm.xlu1 %242, %v39_v2   ;;  %s292_s10 = scalar_lea.vmem %s204_s9, 32  ;;  %p297_p3 = scmp.lt.s32.totalorder %s204_s9, %s204_s9 }
  0x2d   :  { %p293_p2 = scmp.ne.s32.totalorder %s204_s9, %s292_s10  ;;  %p298_p4 = scmp.lt.s32.totalorder %s292_s10, %s292_s10 }
  0x2f   :  { %p299_p5 = por %p298_p4, %p297_p3 }
  0x30   :  { %243 = vset.pattern.permute.xlu0 %v325_v4 }
  0x31   :  { %p300_p6 = pnand %p299_p5, %p293_p2 }
  0xa6   :  { %v44_v5 = vpop.permute.xlu0 %43  ;;  %v65_v6 = vpop.permute.xlu1 %64 }
  0xa7   :  { %v50_v13 = vmul.f32 %v213_v7, %v44_v5  ;;  %v71_v15 = vmul.f32 %v215_v9, %v65_v6 }
  0xab   :  { %v54_v10 = vpop.permute.xlu0 %53  ;;  %v76_v12 = vpop.permute.xlu1 %75 }
  0xac   :  { %v60_v14 = vmul.f32 %v214_v8, %v54_v10  ;;  %v82_v17 = vmul.f32 %v216_v11, %v76_v12 }
  0xae   :  { %v61_v16 = vadd.f32 %v60_v14, %v50_v13 }
  0xb0   :  { %v72_v18 = vadd.f32 %v71_v15, %v61_v16 }
  0xb2   :  { %v83_v20 = vadd.f32 %v82_v17, %v72_v18 }
  0xb4   :  { %v380_v21 = vadd.f32 %v217_v19, %v83_v20 }
  0xb6   :  { %v95_v22 = vand.u32 2139095040, %v380_v21  ;;  %v92_v26 = vand.u32 2147483647, %v380_v21  ;;  %vm94_vm7 = vcmp.lt.s32.totalorder %v380_v21, 0  ;;  %vm184_vm12 = vweird.f32 %v380_v21 }
  0xb8   :  { %v96_v23 = vshrl.u32 %v95_v22, 23  ;;  %v99_v30 = vand.u32 8388607, %v92_v26  ;;  %vm93_vm8 = vcmp.le.f32.partialorder %v92_v26, 0.7853982 }
  0xba   :  { %v218_v24 = vadd.s32 4294967169, %v96_v23  ;;  %v100_v48 = vor.u32 8388608, %v99_v30 }
  0xbc   :  { %v102_v25 = vadd.s32 1, %v218_v24  ;;  %v140_v62 = vshll.u32 %v100_v48, 8 }
  0xbe   :  { %vm103_vm0 = vcmp.gt.s32.totalorder %v102_v25, 0 }
  0xbf   :  { %v104_v27 = vsel %vm103_vm0, %v102_v25, 0 }
  0xc0   :  { %v106_v28 = vand.u32 31, %v104_v27  ;;  %v105_v31 = vshrl.u32 %v104_v27, 5 }
  0xc2   :  { %v107_v29 = vsub.s32 32, %v106_v28  ;;  %v109_v33 = vshll.u32 %v326_v32, %v106_v28  ;;  %v112_v35 = vshll.u32 %v327_v34, %v106_v28  ;;  %v115_v39 = vshll.u32 %v328_v37, %v106_v28 }
  0xc3   :  { %v118_v42 = vshll.u32 %v329_v40, %v106_v28  ;;  %v121_v45 = vshll.u32 %v330_v43, %v106_v28  ;;  %vm124_vm1 = vcmp.lt.s32.totalorder %v105_v31, 1  ;;  %vm127_vm2 = vcmp.lt.s32.totalorder %v105_v31, 4 }
  0xc4   :  { %v110_v36 = vshrl.u32 %v327_v34, %v107_v29  ;;  %v113_v38 = vshrl.u32 %v328_v37, %v107_v29  ;;  %v116_v41 = vshrl.u32 %v329_v40, %v107_v29  ;;  %v119_v44 = vshrl.u32 %v330_v43, %v107_v29 }
  0xc5   :  { %v122_v47 = vshrl.u32 %v331_v46, %v107_v29  ;;  %v108_v57 = vshrl.u32 %v326_v32, %v107_v29  ;;  %vm126_vm3 = vcmp.lt.s32.totalorder %v105_v31, 3  ;;  %vm125_vm4 = vcmp.lt.s32.totalorder %v105_v31, 2 }
  0xc6   :  { %v111_v49 = vor.u32 %v110_v36, %v109_v33  ;;  %v114_v50 = vor.u32 %v113_v38, %v112_v35  ;;  %v117_v51 = vor.u32 %v116_v41, %v115_v39  ;;  %v120_v52 = vor.u32 %v119_v44, %v118_v42 }
  0xc7   :  { %v123_v53 = vor.u32 %v122_v47, %v121_v45 }
  0xc8   :  { %v129_v54 = vsel %vm127_vm2, %v117_v51, 2102212464  ;;  %v132_v55 = vsel %vm124_vm1, %v111_v49, %v114_v50  ;;  %v136_v56 = vsel %vm124_vm1, %v114_v50, %v117_v51  ;;  %v133_v58 = vsel %vm127_vm2, %v120_v52, 920167782 }
  0xc9   :  { %v137_v59 = vsel %vm127_vm2, %v123_v53, 1326507024  ;;  %v134_v60 = vsel %vm126_vm3, %v117_v51, %v133_v58  ;;  %v128_v63 = vsel %vm124_vm1, %v108_v57, %v111_v49  ;;  %v130_v0 = vsel %vm126_vm3, %v114_v50, %v129_v54 }
  0xca   :  { %v138_v61 = vsel %vm126_vm3, %v120_v52, %v137_v59  ;;  %v135_v1 = vsel %vm125_vm4, %v132_v55, %v134_v60  ;;  %v131_v7 = vsel %vm125_vm4, %v128_v63, %v130_v0 }
  0xcb   :  { %v139_v2 = vsel %vm125_vm4, %v136_v56, %v138_v61  ;;  %v389_v5 = vmul.u32.u64.low %v140_v62, %v135_v1  ;;  %v390_v6 = vmul.u32.u64.high %v140_v62, %v135_v1, %v389_v5  ;;  %v147_v9 = vmul.u32 %v140_v62, %v131_v7 }
  0xcc   :  { %v386_v3 = vmul.u32.u64.low %v140_v62, %v139_v2  ;;  %v387_v4 = vmul.u32.u64.high %v140_v62, %v139_v2, %v386_v3 }
  0xcd   :  { %v150_v8 = vadd.s32 1, %v390_v6 }
  0xce   :  { %vm149_vm5 = vc.u32 %v387_v4, %v389_v5  ;;  %v148_v22 = vadd.s32 %v389_v5, %v387_v4 }
  0xcf   :  { %v151_v10 = vsel %vm149_vm5, %v150_v8, %v390_v6 }
  0xd0   :  { %v152_v11 = vadd.s32 %v151_v10, %v147_v9 }
  0xd2   :  { %v153_v12 = vadd.s32 536870912, %v152_v11 }
  0xd4   :  { %v154_v13 = vshrl.u32 %v153_v12, 30 }
  0xd6   :  { %v155_v14 = vshll.u32 %v154_v13, 30  ;;  %v178_v35 = vsub.s32 4, %v154_v13 }
  0xd8   :  { %v156_v15 = vsub.s32 %v152_v11, %v155_v14  ;;  %v179_v38 = vsel %vm94_vm7, %v178_v35, %v154_v13 }
  0xd9   :  { %v181_v40 = vsel %vm93_vm8, 0, %v179_v38 }
  0xda   :  { %v158_v16 = vsub.s32 0, %v156_v15  ;;  %v185_v41 = vadd.s32 3, %v181_v40 }
  0xdc   :  { %v219_v17 = vmin.u32 %v158_v16, %v156_v15  ;;  %v186_v42 = vand.u32 3, %v185_v41 }
  0xde   :  { %v160_v18 = vclz %v219_v17  ;;  %vm191_vm9 = vcmp.eq.s32.totalorder %v186_v42, 2  ;;  %vm188_vm10 = vcmp.eq.s32.totalorder %v186_v42, 0  ;;  %vm187_vm11 = vcmp.lt.s32.totalorder %v186_v42, 2 }
  0xe0   :  { %v220_v19 = vadd.s32 4294967294, %v160_v18 }
  0xe2   :  { %vm221_vm6 = vcmp.lt.s32.totalorder %v220_v19, 0 }
  0xe3   :  { %v163_v20 = vsel %vm221_vm6, 0, %v220_v19 }
  0xe4   :  { %v164_v23 = vsub.s32 32, %v163_v20  ;;  %v168_v24 = vsub.s32 4294967266, %v163_v20  ;;  %v165_v25 = vshll.u32 %v156_v15, %v163_v20 }
  0xe6   :  { %v166_v27 = vshrl.u32 %v148_v22, %v164_v23  ;;  %v169_v28 = vadd.s32 127, %v168_v24 }
  0xe8   :  { %v167_v29 = vor.u32 %v166_v27, %v165_v25  ;;  %v170_v30 = vshll.u32 %v169_v28, 23 }
  0xea   :  { %v171_v31 = vor.u32 4788187, %v170_v30  ;;  %v174_v33 = vcvt.s32.f32 %v167_v29 }
  0xec   :  { %v172_v32 = vand.u32 2147483647, %v171_v31 }
  0xee   :  { %v175_v34 = vmul.f32 %v174_v33, %v172_v32 }
  0xf0   :  { %v176_v36 = vxor.u32 2147483648, %v175_v34 }
  0xf2   :  { %v177_v37 = vsel %vm94_vm7, %v176_v36, %v175_v34 }
  0xf3   :  { %v180_v39 = vsel %vm93_vm8, %v380_v21, %v177_v37 }
  0xf4   :  { %244 = vcosq.f32 %v180_v39 }
  0xf5   :  { %246 = vsinq.f32 %v180_v39 }
  0xfe   :  { %v245_v43 = vpop.eup %244 }
  0xff   :  { %v247_v44 = vpop.eup %246  ;;  %v192_v45 = vxor.u32 2147483648, %v245_v43 }
 0x100   :  { %v189_v46 = vxor.u32 2147483648, %v247_v44 }
 0x101   :  { %v193_v47 = vsel %vm191_vm9, %v192_v45, %v247_v44 }
 0x102   :  { %v190_v26 = vsel %vm188_vm10, %v245_v43, %v189_v46 }
 0x103   :  { %v194_v48 = vsel %vm187_vm11, %v190_v26, %v193_v47 }
 0x104   :  { %v195_v49 = vsel %vm184_vm12, nan, %v194_v48 }
 0x105   :  { %196 = vst [vmem:[#allocation7] sm:$0x3] %v195_v49 }
 0x106   :  { %303 = shalt.err (!%p300_p6)
}
 0x107   :  { %s304_s13 = scalar_lea.hbm %s416_s3, 32 }
 0x108   :  { %p305_p7 = scmp.ne.s32.totalorder %s416_s3, %s304_s13  ;;  %p308_p8 = scmp.lt.u32.totalorder %s304_s13, %s416_s3 }
 0x10a   :  { %p310_p9 = pnand %p308_p8, %p305_p7 }
 0x10c   :  { %313 = shalt.err (!%p310_p9)
}
 0x10d   :  { %206 = dma.vmem_to_hbm [thread:$0]  %s204_s9, 32, %s416_s3, [#allocation4]  }
 0x10e   :  { %318 = dma.done.wait [#allocation4], 32  }
 0x10f   :  { %319 = vsyncadd [#allocation4], 4294967264 }
 0x110   :  { %210 = vsyncpa [#allocation3], 1 }
 0x111   :  { %211 = vsyncpa [#allocation6], 1 }
 0x112   :  { %212 = vsyncpa [#allocation4], 1 }

</bundles_post_ra>
